<compile_context>
chip_gen: v7x
topology: tpu7x:2x2x1
jax: 0.10.0
libtpu: 0.0.40
codegen_flags: <defaults>
</compile_context>

<pallas_src>
import functools

import jax
import jax.numpy as jnp
from jax.experimental import pallas as pl
from jax.experimental.pallas import tpu as pltpu


LANE = 128
SUBLANE = 8


def _round_up(x, m):
    return ((x + m - 1) // m) * m


# ----------------------------------------------------------------------------
# Pallas kernel: one node-row tile of (A @ XW + b) -> ReLU -> Linear.
# ----------------------------------------------------------------------------
def _sig_gcn_kernel(a_ref, xw_ref, bc_ref, wl_ref, bl_ref, o_ref):
    h = jnp.dot(a_ref[...], xw_ref[...],
                preferred_element_type=jnp.float32) + bc_ref[...]
    h = jnp.maximum(h, 0.0)                                       # ReLU
    y = jnp.dot(h.astype(wl_ref.dtype), wl_ref[...],
                preferred_element_type=jnp.float32) + bl_ref[...]
    o_ref[...] = y                                                # lane-dense (128) store


# ----------------------------------------------------------------------------
# Generation-aware sizing helpers
# ----------------------------------------------------------------------------
def _device_profile():
    kind = ""
    try:
        kind = jax.devices()[0].device_kind.lower()
    except Exception:
        pass
    is_v7 = "v7" in kind
    vmem_phys = (64 if is_v7 else 128) * 1024 * 1024   # per-TensorCore VMEM
    return dict(
        num_tc=2 if is_v7 else 1,
        vmem_phys=vmem_phys,
        tile_budget_bytes=int(vmem_phys * 0.40),       # headroom for compiler scratch
    )


def _min_sublane_tile(dtype):
    itemsize = jnp.dtype(dtype).itemsize
    return max(SUBLANE, SUBLANE * (4 // max(itemsize, 1)))   # 8 f32, 16 bf16, 32 int8/fp8


def _vmem_footprint(tile_n, n_pad, a_itemsize, xw_itemsize, f_h_pad, f_out_pad,
                    a_buffers):
    a_bytes = a_buffers * tile_n * n_pad * a_itemsize        # streamed A tiles
    xw_bytes = n_pad * f_h_pad * xw_itemsize                 # resident XW
    w_bytes = (f_h_pad * f_out_pad * xw_itemsize             # resident W_lin
               + 2 * f_h_pad * 4 + 2 * f_out_pad * 4)        # biases (double-buffered)
    out_bytes = 2 * tile_n * f_out_pad * 4                   # output tiles
    return a_bytes + xw_bytes + w_bytes + out_bytes


def _auto_tile_n(n, min_tile, a_itemsize, xw_itemsize, f_h_pad, f_out_pad,
                 a_buffers, prof):
    n_min_pad = _round_up(max(n, min_tile), min_tile)
    cands = sorted({c for c in (n_min_pad, 1024, 512, 256, 128, 64, 32, 16, 8)
                    if min_tile <= c <= n_min_pad and c % min_tile == 0},
                   reverse=True)
    if not cands:
        cands = [min_tile]
    tile_n = cands[-1]
    for c in cands:                                   # biggest tile that fits VMEM budget
        n_pad = _round_up(n, c)
        if _vmem_footprint(c, n_pad, a_itemsize, xw_itemsize, f_h_pad, f_out_pad,
                           a_buffers) <= prof["tile_budget_bytes"]:
            tile_n = c
            break
    if prof["num_tc"] > 1:
        # keep >= num_tc row tiles so dimension_semantics=("parallel",) feeds both cores
        cap = (n_min_pad // prof["num_tc"]) // min_tile * min_tile
        if cap >= min_tile:
            tile_n = min(tile_n, cap)
    return tile_n


# ----------------------------------------------------------------------------
# One-time setup (plain JAX, hoisted out of the hot path)
# ----------------------------------------------------------------------------
def build_gcn_norm(edge_index, edge_weight, num_nodes):
    """Dense GCN-normalized adjacency D^{-1/2} (A + I) D^{-1/2}."""
    row, col = edge_index[0], edge_index[1]
    if edge_weight is None:
        edge_weight = jnp.ones((edge_index.shape[1],), jnp.float32)
    adj = jnp.zeros((num_nodes, num_nodes), jnp.float32).at[row, col].add(edge_weight)
    adj = adj + jnp.eye(num_nodes, dtype=jnp.float32)          # add self loops
    deg = adj.sum(axis=1)
    dinv = jnp.where(deg > 0.0, jax.lax.rsqrt(jnp.maximum(deg, 1e-30)), 0.0)
    return dinv[:, None] * adj * dinv[None, :]


def prepare_sig_gcn(params, a_norm, *, tile_n=None, compute_dtype=jnp.bfloat16,
                    a_buffers=2):
    """Per-graph / per-parameter setup: lane/sublane-aligned padding, compute-dtype
    casts of the matmul operands (biases stay f32, added post-accumulation), and
    generation-aware tile / VMEM-limit selection."""
    n = a_norm.shape[0]
    f_in, f_h = params["w_conv"].shape
    f_out = params["w_lin_t"].shape[1]

    prof = _device_profile()
    f_h_pad = _round_up(f_h, LANE)
    f_out_pad = _round_up(f_out, LANE)
    a_itemsize = jnp.dtype(compute_dtype).itemsize
    min_tile = _min_sublane_tile(compute_dtype)

    if tile_n is None:
        tile_n = _auto_tile_n(n, min_tile, a_itemsize, a_itemsize,
                              f_h_pad, f_out_pad, a_buffers, prof)
    else:
        tile_n = max(min_tile, _round_up(min(tile_n, _round_up(n, min_tile)), min_tile))
    n_pad = _round_up(n, tile_n)

    footprint = _vmem_footprint(tile_n, n_pad, a_itemsize, a_itemsize,
                                f_h_pad, f_out_pad, a_buffers)
    vmem_limit = int(min(prof["vmem_phys"] - 8 * 1024 * 1024,
                         max(footprint + 4 * 1024 * 1024, 16 * 1024 * 1024)))

    def pad2(a, r, c):
        return jnp.pad(a, ((0, r - a.shape[0]), (0, c - a.shape[1])))

    return dict(
        a=pad2(a_norm, n_pad, n_pad).astype(compute_dtype),
        # W_conv stays f32: X @ W_conv is done once per call in the wrapper (f32).
        w_conv=pad2(params["w_conv"], f_in, f_h_pad).astype(jnp.float32),
        b_conv=pad2(params["b_conv"], 1, f_h_pad).astype(jnp.float32),
        w_lin=pad2(params["w_lin_t"], f_h_pad, f_out_pad).astype(compute_dtype),
        b_lin=pad2(params["b_lin"], 1, f_out_pad).astype(jnp.float32),
        meta=dict(n=n, n_pad=n_pad, tile_n=tile_n,
                  f_h_pad=f_h_pad, f_out=f_out, f_out_pad=f_out_pad,
                  compute_dtype=compute_dtype, a_buffers=a_buffers,
                  vmem_limit=vmem_limit),
    )


# ----------------------------------------------------------------------------
# Forward wrapper: XW precompute + node-row-tiled pallas_call
# ----------------------------------------------------------------------------
def sig_gcn_forward(x, prepared):
    m = prepared["meta"]
    n, n_pad, tile_n = m["n"], m["n_pad"], m["tile_n"]
    f_h_pad, f_out_pad = m["f_h_pad"], m["f_out_pad"]
    dt = m["compute_dtype"]

    # X @ W_conv once per call, in f32, then a single cast to the compute dtype.
    x_pad = jnp.pad(x.astype(jnp.float32), ((0, n_pad - x.shape[0]), (0, 0)))
    xw = jnp.dot(x_pad, prepared["w_conv"],
                 preferred_element_type=jnp.float32).astype(dt)

    a_spec_kwargs = {}
    if m["a_buffers"] != 2:
        a_spec_kwargs["pipeline_mode"] = pl.Buffered(m["a_buffers"])
    full = lambda shape: pl.BlockSpec(shape, lambda i: (0, 0))

    out_pad = pl.pallas_call(
        _sig_gcn_kernel,
        out_shape=jax.ShapeDtypeStruct((n_pad, f_out_pad), jnp.float32),
        grid=(n_pad // tile_n,),
        in_specs=[
            pl.BlockSpec((tile_n, n_pad), lambda i: (i, 0),
                         **a_spec_kwargs),                 # A_hat row tile (streamed)
            full((n_pad, f_h_pad)),                        # XW        (resident)
            full((1, f_h_pad)),                            # b_conv
            full((f_h_pad, f_out_pad)),                    # W_lin^T
            full((1, f_out_pad)),                          # b_lin
        ],
        out_specs=pl.BlockSpec((tile_n, f_out_pad), lambda i: (i, 0)),
        compiler_params=pltpu.CompilerParams(
            dimension_semantics=("parallel",),
            vmem_limit_bytes=m["vmem_limit"],
        ),
    )(prepared["a"], xw, prepared["b_conv"], prepared["w_lin"], prepared["b_lin"])
    # TODO(synk): for a fused consumer, return the padded (n_pad, 128) block (or a
    #             bf16 output) instead of slicing here.
    return out_pad[:n, :m["f_out"]]


# ----------------------------------------------------------------------------
# Parameters (shapes match GCNConv(f_in, f_hidden) + nn.Linear(f_hidden, f_out))
# ----------------------------------------------------------------------------
def init_params(key, f_in, f_hidden, f_out):
    k1, k2, k3 = jax.random.split(key, 3)

    def glorot(k, shape):
        limit = float(jnp.sqrt(6.0 / (shape[0] + shape[1])))
        return jax.random.uniform(k, shape, jnp.float32, -limit, limit)

    # GCNConv: weight [f_in, f_hidden] (glorot), bias zeros (added after propagation).
    w_conv = glorot(k1, (f_in, f_hidden))
    b_conv = jnp.zeros((1, f_hidden), jnp.float32)
    # nn.Linear(f_hidden, f_out): weight [f_out, f_hidden]; stored transposed.
    bound = float(f_hidden) ** -0.5
    w_lin = jax.random.uniform(k2, (f_out, f_hidden), jnp.float32, -bound, bound)
    b_lin = jax.random.uniform(k3, (1, f_out), jnp.float32, -bound, bound)
    return dict(w_conv=w_conv, b_conv=b_conv, w_lin_t=w_lin.T, b_lin=b_lin)


# ----------------------------------------------------------------------------
# Pure-JAX f32 reference (true-f32 matmuls) for correctness checks
# ----------------------------------------------------------------------------
def _ref_forward(x, edge_index, params, edge_weight=None):
    dot = functools.partial(jnp.dot, precision=jax.lax.Precision.HIGHEST)
    n = x.shape[0]
    a = build_gcn_norm(edge_index, edge_weight, n)
    h = dot(a, dot(x, params["w_conv"])) + params["b_conv"]     # GCNConv
    h = jnp.maximum(h, 0.0)                                     # ReLU
    return dot(h, params["w_lin_t"]) + params["b_lin"]          # Linear


if __name__ == "__main__":
    # num_channels = [4, 32, 8]  ->  GCNConv(4, 32), Linear(32, 8)
    N_NODES, F_IN, F_HIDDEN, F_OUT = 256, 4, 32, 8

    key = jax.random.PRNGKey(0)
    k_x, k_p = jax.random.split(key)
    x = jax.random.normal(k_x, (N_NODES, F_IN), jnp.float32)

    # Deterministic bidirectional ring graph: edge_index [2, 2N]
    src = jnp.arange(N_NODES, dtype=jnp.int32)
    dst = (src + 1) % N_NODES
    edge_index = jnp.stack(
        [jnp.concatenate([src, dst]), jnp.concatenate([dst, src])], axis=0)

    params = init_params(k_p, F_IN, F_HIDDEN, F_OUT)

    # One-time graph setup (hoisted out of the per-call path).
    a_norm = build_gcn_norm(edge_index, None, N_NODES)
    ref = _ref_forward(x, edge_index, params)

    # f32 kernel path: tight check against the f32 reference.
    prep_f32 = prepare_sig_gcn(params, a_norm, compute_dtype=jnp.float32)
    out_f32 = jax.block_until_ready(sig_gcn_forward(x, prep_f32))
    assert out_f32.shape == (N_NODES, F_OUT)
    assert jnp.allclose(out_f32, ref, atol=1e-4, rtol=1e-4), "f32 mismatch vs reference"

    # bf16-operand fast path (f32 accumulation): looser tolerance.
    prep_bf16 = prepare_sig_gcn(params, a_norm, compute_dtype=jnp.bfloat16)
    out_bf16 = jax.block_until_ready(sig_gcn_forward(x, prep_bf16))
    assert out_bf16.shape == (N_NODES, F_OUT)
    assert jnp.allclose(out_bf16, ref, atol=5e-2, rtol=5e-2), "bf16 mismatch vs reference"

    print("KERNEL_OK")
</pallas_src>

<mosaic_0001>
module attributes {stable_mosaic.version = 11 : i64} {
  func.func @_sig_gcn_kernel(%arg0: i32, %arg1: memref<256x256xf32, #tpu.memory_space<vmem>>, %arg2: memref<256x128xf32, #tpu.memory_space<vmem>>, %arg3: memref<1x128xf32, #tpu.memory_space<vmem>>, %arg4: memref<128x128xf32, #tpu.memory_space<vmem>>, %arg5: memref<1x128xf32, #tpu.memory_space<vmem>>, %arg6: memref<256x128xf32, #tpu.memory_space<vmem>>) attributes {dimension_semantics = [#tpu.dimension_semantics<parallel>], iteration_bounds = array<i64: 1>, scalar_prefetch = 0 : i64, scratch_operands = 0 : i64, tpu.core_type = #tpu.core_type<tc>, window_params = [{transform_indices = @transform_0, window_bounds = array<i64: 256, 256>}, {pipeline_mode = #tpu.pipeline_mode<synchronous>, transform_indices = @transform_1, window_bounds = array<i64: 256, 128>}, {pipeline_mode = #tpu.pipeline_mode<synchronous>, transform_indices = @transform_2, window_bounds = array<i64: 1, 128>}, {pipeline_mode = #tpu.pipeline_mode<synchronous>, transform_indices = @transform_3, window_bounds = array<i64: 128, 128>}, {pipeline_mode = #tpu.pipeline_mode<synchronous>, transform_indices = @transform_4, window_bounds = array<i64: 1, 128>}, {transform_indices = @transform_5, window_bounds = array<i64: 256, 128>}]} {
    %c0 = arith.constant 0 : index
    %c0_0 = arith.constant 0 : index
    %0 = vector.load %arg1[%c0, %c0_0] : memref<256x256xf32, #tpu.memory_space<vmem>>, vector<256x256xf32>
    %c0_1 = arith.constant 0 : index
    %c0_2 = arith.constant 0 : index
    %1 = vector.load %arg2[%c0_1, %c0_2] : memref<256x128xf32, #tpu.memory_space<vmem>>, vector<256x128xf32>
    %cst = arith.constant dense<0.000000e+00> : vector<256x128xf32>
    %2 = tpu.matmul %0, %1, %cst {dimension_numbers = #tpu.dot_dimension_numbers<[1], [0], [0], [1], [0, 0, 1, 1], [], []>} : vector<256x256xf32>, vector<256x128xf32>, vector<256x128xf32> -> vector<256x128xf32>
    %c0_3 = arith.constant 0 : index
    %c0_4 = arith.constant 0 : index
    %3 = vector.load %arg3[%c0_3, %c0_4] : memref<1x128xf32, #tpu.memory_space<vmem>>, vector<1x128xf32>
    %4 = vector.broadcast %3 : vector<1x128xf32> to vector<256x128xf32>
    %5 = arith.addf %2, %4 : vector<256x128xf32>
    %cst_5 = arith.constant 0.000000e+00 : f32
    %6 = vector.broadcast %cst_5 : f32 to vector<256x128xf32>
    %7 = arith.maximumf %5, %6 : vector<256x128xf32>
    %c0_6 = arith.constant 0 : index
    %c0_7 = arith.constant 0 : index
    %8 = vector.load %arg4[%c0_6, %c0_7] : memref<128x128xf32, #tpu.memory_space<vmem>>, vector<128x128xf32>
    %cst_8 = arith.constant dense<0.000000e+00> : vector<256x128xf32>
    %9 = tpu.matmul %7, %8, %cst_8 {dimension_numbers = #tpu.dot_dimension_numbers<[1], [0], [0], [1], [0, 0, 1, 1], [], []>} : vector<256x128xf32>, vector<128x128xf32>, vector<256x128xf32> -> vector<256x128xf32>
    %c0_9 = arith.constant 0 : index
    %c0_10 = arith.constant 0 : index
    %10 = vector.load %arg5[%c0_9, %c0_10] : memref<1x128xf32, #tpu.memory_space<vmem>>, vector<1x128xf32>
    %11 = vector.broadcast %10 : vector<1x128xf32> to vector<256x128xf32>
    %12 = arith.addf %9, %11 : vector<256x128xf32>
    %c0_11 = arith.constant 0 : index
    %c0_12 = arith.constant 0 : index
    %13 = vector.load %arg6[%c0_11, %c0_12] : memref<256x128xf32, #tpu.memory_space<vmem>>, vector<256x128xf32>
    tpu.vector_store %arg6[%c0_11, %c0_12], %12 {strides = array<i32>} : memref<256x128xf32, #tpu.memory_space<vmem>>, vector<256x128xf32>,
    return
  }
  func.func @transform_0(%arg0: i32) -> (i32, i32) {
    %c0_i32 = arith.constant 0 : i32
    %c0_i32_0 = arith.constant 0 : i32
    return %arg0, %c0_i32 : i32, i32
  }
  func.func @transform_1(%arg0: i32) -> (i32, i32) {
    %c0_i32 = arith.constant 0 : i32
    %c0_i32_0 = arith.constant 0 : i32
    %c0_i32_1 = arith.constant 0 : i32
    return %c0_i32, %c0_i32_0 : i32, i32
  }
  func.func @transform_2(%arg0: i32) -> (i32, i32) {
    %c0_i32 = arith.constant 0 : i32
    %c0_i32_0 = arith.constant 0 : i32
    %c0_i32_1 = arith.constant 0 : i32
    return %c0_i32, %c0_i32_0 : i32, i32
  }
  func.func @transform_3(%arg0: i32) -> (i32, i32) {
    %c0_i32 = arith.constant 0 : i32
    %c0_i32_0 = arith.constant 0 : i32
    %c0_i32_1 = arith.constant 0 : i32
    return %c0_i32, %c0_i32_0 : i32, i32
  }
  func.func @transform_4(%arg0: i32) -> (i32, i32) {
    %c0_i32 = arith.constant 0 : i32
    %c0_i32_0 = arith.constant 0 : i32
    %c0_i32_1 = arith.constant 0 : i32
    return %c0_i32, %c0_i32_0 : i32, i32
  }
  func.func @transform_5(%arg0: i32) -> (i32, i32) {
    %c0_i32 = arith.constant 0 : i32
    %c0_i32_0 = arith.constant 0 : i32
    return %arg0, %c0_i32 : i32, i32
  }
}

</mosaic_0001>

<bundles_post_ra>
// kernel: tpu_custom_call.1
= control target key start
LH: loop header
LB: loop body
LE: loop exit
PB: predicated region body
PF: predicated region fallthrough
CT: control target
= control target key end

     0   :  { %10 = vsyncpa [#allocation3], 0  ;;  %s1291_s0 = inlined_call_operand.hbm [shape: f32[256,256], index: 0, kind: input, shape index: {}]   ;;  %s1292_s1 = inlined_call_operand.hbm [shape: f32[256,128], index: 1, kind: input, shape index: {}]   ;;  %s1293_s2 = inlined_call_operand.vmem [shape: f32[1,128], index: 2, kind: input, shape index: {}]   ;;  %s1294_s3 = inlined_call_operand.hbm [shape: f32[128,128], index: 3, kind: input, shape index: {}]   ;;  %s1295_s4 = inlined_call_operand.vmem [shape: f32[1,128], index: 4, kind: input, shape index: {}]   ;;  %s1296_s5 = inlined_call_operand.hbm [shape: f32[256,128], index: 5, kind: output, shape index: {}]  }
   0x1   :  { %11 = vsyncpa [#allocation6], 0 }
   0x2   :  { %12 = vsyncpa [#allocation4], 0  ;;  %s1065_s18 = smov [#allocation5]   ;;  %s971_s22 = scalar_lea.hbm %s1292_s1, 4096 }
   0x3   :  { %s30_s19 = sshll.u32 %s1065_s18, 4  ;;  %p972_p0 = scmp.ne.s32.totalorder %s1292_s1, %s971_s22  ;;  %s31_s19 = int_to_ptr.vmem [resolvable:$true] %s30_s19 }
   0x4   :  { %p975_p1 = scmp.lt.u32.totalorder %s971_s22, %s1292_s1 }
   0x6   :  { %p977_p2 = pnand %p975_p1, %p972_p0 }
   0x8   :  { %980 = shalt.err (!%p977_p2)
}
   0x9   :  { %s981_s27 = scalar_lea.vmem %s31_s19, 4096  ;;  %p986_p4 = scmp.lt.s32.totalorder %s31_s19, %s31_s19 }
   0xa   :  { %p982_p3 = scmp.ne.s32.totalorder %s31_s19, %s981_s27  ;;  %p987_p5 = scmp.lt.s32.totalorder %s981_s27, %s981_s27 }
   0xc   :  { %p988_p6 = por %p987_p5, %p986_p4 }
   0xe   :  { %p989_p7 = pnand %p988_p6, %p982_p3 }
  0x10   :  { %992 = shalt.err (!%p989_p7)
}
  0x11   :  { %s1066_s28 = smov 128   ;;  %s1067_s29 = smov 8  }
  0x12   :  { %36 = dma.hbm_to_vmem [thread:$0]  %s1292_s1, 4096, %s31_s19, [#allocation6], %s1066_s28, %s1066_s28, %s1067_s29  }
  0x13   :  { %s1068_s7 = smov [#allocation2]   ;;  %s993_s11 = scalar_lea.hbm %s1291_s0, 8192 }
  0x14   :  { %s18_s8 = sshll.u32 %s1068_s7, 4  ;;  %p994_p8 = scmp.ne.s32.totalorder %s1291_s0, %s993_s11  ;;  %s19_s8 = int_to_ptr.vmem [resolvable:$true] %s18_s8 }
  0x15   :  { %p997_p9 = scmp.lt.u32.totalorder %s993_s11, %s1291_s0 }
  0x17   :  { %p999_p10 = pnand %p997_p9, %p994_p8 }
  0x19   :  { %1002 = shalt.err (!%p999_p10)
}
  0x1a   :  { %s1003_s16 = scalar_lea.vmem %s19_s8, 8192  ;;  %p1008_p12 = scmp.lt.s32.totalorder %s19_s8, %s19_s8 }
  0x1b   :  { %p1004_p11 = scmp.ne.s32.totalorder %s19_s8, %s1003_s16  ;;  %p1009_p13 = scmp.lt.s32.totalorder %s1003_s16, %s1003_s16 }
  0x1d   :  { %p1010_p0 = por %p1009_p13, %p1008_p12 }
  0x1f   :  { %p1011_p1 = pnand %p1010_p0, %p1004_p11 }
  0x21   :  { %1014 = shalt.err (!%p1011_p1)
}
  0x22   :  { %s1069_s1 = smov 256   ;;  %s1070_s17 = smov 16  }
  0x23   :  { %24 = dma.hbm_to_vmem [thread:$0]  %s1291_s0, 8192, %s19_s8, [#allocation3], %s1069_s1, %s1069_s1, %s1070_s17  }
  0x24   :  { %s1071_s20 = smov [#allocation7]   ;;  %s1015_s24 = scalar_lea.hbm %s1294_s3, 2048 }
  0x25   :  { %s44_s21 = sshll.u32 %s1071_s20, 4  ;;  %p1016_p2 = scmp.ne.s32.totalorder %s1294_s3, %s1015_s24  ;;  %s45_s21 = int_to_ptr.vmem [resolvable:$true] %s44_s21 }
  0x26   :  { %p1019_p3 = scmp.lt.u32.totalorder %s1015_s24, %s1294_s3 }
  0x28   :  { %p1021_p4 = pnand %p1019_p3, %p1016_p2 }
  0x2a   :  { %1024 = shalt.err (!%p1021_p4)
}
  0x2b   :  { %s1025_s6 = scalar_lea.vmem %s45_s21, 2048  ;;  %p1030_p6 = scmp.lt.s32.totalorder %s45_s21, %s45_s21 }
  0x2c   :  { %p1026_p5 = scmp.ne.s32.totalorder %s45_s21, %s1025_s6  ;;  %p1031_p7 = scmp.lt.s32.totalorder %s1025_s6, %s1025_s6 }
  0x2e   :  { %p1032_p8 = por %p1031_p7, %p1030_p6 }
  0x30   :  { %p1033_p9 = pnand %p1032_p8, %p1026_p5 }
  0x32   :  { %1036 = shalt.err (!%p1033_p9)
}
  0x33   :  { %50 = dma.hbm_to_vmem [thread:$0]  %s1294_s3, 2048, %s45_s21, [#allocation6], %s1066_s28, %s1066_s28, %s1067_s29  }
  0x34   :  { %1059 = dma.done.wait [#allocation3], 8192  }
  0x35   :  { %1060 = vsyncadd [#allocation3], 4294959104 }
  0x36   :  { %1061 = dma.done.wait [#allocation6], 6144  }
  0x37   :  { %1062 = vsyncadd [#allocation6], 4294961152  ;;  %v1072_v0 = vmov 0.0|0.0   ;;  %v126_v1 = vld [vmem:[#allocation5] sm:$0xff]  ;;  %v127_v2 = vld [vmem:[#allocation5 + $0x8] sm:$0xff] }
  0x38   :  { %850 = vmatprep.subr.bf16.mxu0 %v1072_v0  ;;  %930 = vmatprep.subr.bf16.mxu1 %v1072_v0  ;;  %v128_v3 = vld [vmem:[#allocation5 + $0x10] sm:$0xff]  ;;  %v851_v4 = vpack.c.bf16 %v127_v2, %v126_v1  ;;  %v129_v5 = vld [vmem:[#allocation5 + $0x18] sm:$0xff]  ;;  %v130_v7 = vld [vmem:[#allocation5 + $0x20] sm:$0xff] }
  0x39   :  { %v854_v6 = vpack.c.bf16 %v129_v5, %v128_v3  ;;  %v131_v8 = vld [vmem:[#allocation5 + $0x28] sm:$0xff]  ;;  %v132_v10 = vld [vmem:[#allocation5 + $0x30] sm:$0xff]  ;;  %v133_v11 = vld [vmem:[#allocation5 + $0x38] sm:$0xff] }
  0x3a   :  { %852 = vmatpush1.bf16.msra.mxu0 %v851_v4  ;;  %946 = vmatpush1.bf16.msra.mxu1 %v851_v4  ;;  %v857_v9 = vpack.c.bf16 %v131_v8, %v130_v7  ;;  %v63_v12 = vld [vmem:[#allocation2 + $0x8] sm:$0xff]  ;;  %v860_v13 = vpack.c.bf16 %v133_v11, %v132_v10  ;;  %v134_v14 = vld [vmem:[#allocation5 + $0x40] sm:$0xff]  ;;  %v136_v17 = vld [vmem:[#allocation5 + $0x50] sm:$0xff] }
  0x3b   :  { %853 = vmatprep.subr.bf16.mxu0 %v1072_v0  ;;  %931 = vmatprep.subr.bf16.mxu1 %v1072_v0  ;;  %v135_v15 = vld [vmem:[#allocation5 + $0x48] sm:$0xff]  ;;  %v137_v18 = vld [vmem:[#allocation5 + $0x58] sm:$0xff]  ;;  %v138_v20 = vld [vmem:[#allocation5 + $0x60] sm:$0xff] }
  0x3c   :  { %229 = vmatprep.mubr.f32.mxu0 %v63_v12  ;;  %v863_v16 = vpack.c.bf16 %v135_v15, %v134_v14  ;;  %v866_v19 = vpack.c.bf16 %v137_v18, %v136_v17  ;;  %v139_v21 = vld [vmem:[#allocation5 + $0x68] sm:$0xff]  ;;  %v140_v23 = vld [vmem:[#allocation5 + $0x70] sm:$0xff]  ;;  %v141_v24 = vld [vmem:[#allocation5 + $0x78] sm:$0xff] }
  0x3d   :  { %v869_v22 = vpack.c.bf16 %v139_v21, %v138_v20  ;;  %v111_v25 = vld [vmem:[#allocation2 + $0x188] sm:$0xff]  ;;  %v872_v26 = vpack.c.bf16 %v141_v24, %v140_v23  ;;  %v142_v27 = vld [vmem:[#allocation5 + $0x80] sm:$0xff]  ;;  %v144_v30 = vld [vmem:[#allocation5 + $0x90] sm:$0xff] }
  0x3e   :  { %855 = vmatpush1.bf16.msra.mxu0 %v854_v6  ;;  %947 = vmatpush1.bf16.msra.mxu1 %v854_v6  ;;  %v143_v28 = vld [vmem:[#allocation5 + $0x88] sm:$0xff]  ;;  %v145_v31 = vld [vmem:[#allocation5 + $0x98] sm:$0xff]  ;;  %v146_v33 = vld [vmem:[#allocation5 + $0xa0] sm:$0xff] }
  0x3f   :  { %856 = vmatprep.subr.bf16.mxu0 %v1072_v0  ;;  %932 = vmatprep.subr.bf16.mxu1 %v1072_v0  ;;  %v875_v29 = vpack.c.bf16 %v143_v28, %v142_v27  ;;  %v878_v32 = vpack.c.bf16 %v145_v31, %v144_v30  ;;  %v147_v34 = vld [vmem:[#allocation5 + $0xa8] sm:$0xff]  ;;  %v148_v36 = vld [vmem:[#allocation5 + $0xb0] sm:$0xff]  ;;  %v149_v37 = vld [vmem:[#allocation5 + $0xb8] sm:$0xff] }
  0x40   :  { %349 = vmatprep.mubr.f32.mxu1 %v111_v25  ;;  %v881_v35 = vpack.c.bf16 %v147_v34, %v146_v33  ;;  %v884_v38 = vpack.c.bf16 %v149_v37, %v148_v36  ;;  %v150_v39 = vld [vmem:[#allocation5 + $0xc0] sm:$0xff]  ;;  %v151_v40 = vld [vmem:[#allocation5 + $0xc8] sm:$0xff]  ;;  %v152_v42 = vld [vmem:[#allocation5 + $0xd0] sm:$0xff] }
  0x41   :  { %v887_v41 = vpack.c.bf16 %v151_v40, %v150_v39  ;;  %v153_v43 = vld [vmem:[#allocation5 + $0xd8] sm:$0xff]  ;;  %v154_v45 = vld [vmem:[#allocation5 + $0xe0] sm:$0xff]  ;;  %v155_v46 = vld [vmem:[#allocation5 + $0xe8] sm:$0xff] }
  0x42   :  { %858 = vmatpush1.bf16.msra.mxu0 %v857_v9  ;;  %948 = vmatpush1.bf16.msra.mxu1 %v857_v9  ;;  %v890_v44 = vpack.c.bf16 %v153_v43, %v152_v42  ;;  %v893_v47 = vpack.c.bf16 %v155_v46, %v154_v45  ;;  %v156_v48 = vld [vmem:[#allocation5 + $0xf0] sm:$0xff]  ;;  %v157_v49 = vld [vmem:[#allocation5 + $0xf8] sm:$0xff]  ;;  %v422_v50 = vld [vmem:[#allocation7] sm:$0xff] }
  0x43   :  { %859 = vmatprep.subr.bf16.mxu0 %v1072_v0  ;;  %933 = vmatprep.subr.bf16.mxu1 %v1072_v0  ;;  %v423_v51 = vld [vmem:[#allocation7 + $0x8] sm:$0xff]  ;;  %v896_v52 = vpack.c.bf16 %v157_v49, %v156_v48  ;;  %v424_v54 = vld [vmem:[#allocation7 + $0x10] sm:$0xff]  ;;  %v425_v55 = vld [vmem:[#allocation7 + $0x18] sm:$0xff] }
  0x44   :  { %v898_v53 = vpack.c.bf16 %v423_v51, %v422_v50  ;;  %v62_v56 = vld [vmem:[#allocation2] sm:$0xff]  ;;  %v65_v57 = vld [vmem:[#allocation2 + $0x18] sm:$0xff]  ;;  %v902_v60 = vpack.c.bf16 %v425_v55, %v424_v54  ;;  %v427_v62 = vld [vmem:[#allocation7 + $0x28] sm:$0xff] }
  0x45   :  { %v110_v58 = vld [vmem:[#allocation2 + $0x180] sm:$0xff]  ;;  %v113_v59 = vld [vmem:[#allocation2 + $0x198] sm:$0xff]  ;;  %v64_v63 = vld [vmem:[#allocation2 + $0x10] sm:$0xff] }
  0x46   :  { %861 = vmatpush1.bf16.msra.mxu0 %v860_v13  ;;  %949 = vmatpush1.bf16.msra.mxu1 %v860_v13  ;;  %v426_v61 = vld [vmem:[#allocation7 + $0x20] sm:$0xff]  ;;  %v67_v1 = vld [vmem:[#allocation2 + $0x28] sm:$0xff]  ;;  %v428_v4 = vld [vmem:[#allocation7 + $0x30] sm:$0xff] }
  0x47   :  { %862 = vmatprep.subr.bf16.mxu0 %v1072_v0  ;;  %934 = vmatprep.subr.bf16.mxu1 %v1072_v0  ;;  %v115_v2 = vld [vmem:[#allocation2 + $0x1a8] sm:$0xff]  ;;  %v906_v3 = vpack.c.bf16 %v427_v62, %v426_v61  ;;  %v429_v5 = vld [vmem:[#allocation7 + $0x38] sm:$0xff]  ;;  %v66_v6 = vld [vmem:[#allocation2 + $0x20] sm:$0xff] }
  0x48   :  { %v69_v7 = vld [vmem:[#allocation2 + $0x38] sm:$0xff]  ;;  %v114_v8 = vld [vmem:[#allocation2 + $0x1a0] sm:$0xff]  ;;  %v910_v10 = vpack.c.bf16 %v429_v5, %v428_v4  ;;  %v431_v12 = vld [vmem:[#allocation7 + $0x48] sm:$0xff] }
  0x49   :  { %v117_v9 = vld [vmem:[#allocation2 + $0x1b8] sm:$0xff]  ;;  %v430_v11 = vld [vmem:[#allocation7 + $0x40] sm:$0xff]  ;;  %v68_v13 = vld [vmem:[#allocation2 + $0x30] sm:$0xff] }
  0x4a   :  { %864 = vmatpush1.bf16.msra.mxu0 %v863_v16  ;;  %950 = vmatpush1.bf16.msra.mxu1 %v863_v16  ;;  %v71_v14 = vld [vmem:[#allocation2 + $0x48] sm:$0xff]  ;;  %v116_v15 = vld [vmem:[#allocation2 + $0x1b0] sm:$0xff]  ;;  %v914_v17 = vpack.c.bf16 %v431_v12, %v430_v11  ;;  %v70_v20 = vld [vmem:[#allocation2 + $0x40] sm:$0xff] }
  0x4b   :  { %865 = vmatprep.subr.bf16.mxu0 %v1072_v0  ;;  %935 = vmatprep.subr.bf16.mxu1 %v1072_v0  ;;  %v119_v16 = vld [vmem:[#allocation2 + $0x1c8] sm:$0xff]  ;;  %v432_v18 = vld [vmem:[#allocation7 + $0x50] sm:$0xff]  ;;  %v73_v21 = vld [vmem:[#allocation2 + $0x58] sm:$0xff] }
  0x4c   :  { %v121_v23 = vld [vmem:[#allocation2 + $0x1d8] sm:$0xff]  ;;  %v72_v25 = vld [vmem:[#allocation2 + $0x50] sm:$0xff]  ;;  %v123_v28 = vld [vmem:[#allocation2 + $0x1e8] sm:$0xff] }
  0x4d   :  { %v120_v27 = vld [vmem:[#allocation2 + $0x1d0] sm:$0xff]  ;;  %v77_v30 = vld [vmem:[#allocation2 + $0x78] sm:$0xff]  ;;  %v122_v31 = vld [vmem:[#allocation2 + $0x1e0] sm:$0xff] }
  0x4e   :  { %867 = vmatpush1.bf16.msra.mxu0 %v866_v19  ;;  %951 = vmatpush1.bf16.msra.mxu1 %v866_v19  ;;  %v433_v19 = vld [vmem:[#allocation7 + $0x58] sm:$0xff]  ;;  %v76_v33 = vld [vmem:[#allocation2 + $0x70] sm:$0xff]  ;;  %v79_v34 = vld [vmem:[#allocation2 + $0x88] sm:$0xff] }
  0x4f   :  { %868 = vmatprep.subr.bf16.mxu0 %v1072_v0  ;;  %936 = vmatprep.subr.bf16.mxu1 %v1072_v0  ;;  %v918_v24 = vpack.c.bf16 %v433_v19, %v432_v18  ;;  %v78_v36 = vld [vmem:[#allocation2 + $0x80] sm:$0xff]  ;;  %v81_v37 = vld [vmem:[#allocation2 + $0x98] sm:$0xff]  ;;  %v83_v39 = vld [vmem:[#allocation2 + $0xa8] sm:$0xff] }
  0x50   :  { %v82_v40 = vld [vmem:[#allocation2 + $0xa0] sm:$0xff]  ;;  %v84_v42 = vld [vmem:[#allocation2 + $0xb0] sm:$0xff]  ;;  %v87_v43 = vld [vmem:[#allocation2 + $0xc8] sm:$0xff] }
  0x51   :  { %v89_v45 = vld [vmem:[#allocation2 + $0xd8] sm:$0xff]  ;;  %v88_v46 = vld [vmem:[#allocation2 + $0xd0] sm:$0xff]  ;;  %v90_v48 = vld [vmem:[#allocation2 + $0xe0] sm:$0xff] }
  0x52   :  { %870 = vmatpush1.bf16.msra.mxu0 %v869_v22  ;;  %952 = vmatpush1.bf16.msra.mxu1 %v869_v22  ;;  %v118_v22 = vld [vmem:[#allocation2 + $0x1c0] sm:$0xff]  ;;  %v93_v49 = vld [vmem:[#allocation2 + $0xf8] sm:$0xff]  ;;  %v92_v50 = vld [vmem:[#allocation2 + $0xf0] sm:$0xff] }
  0x53   :  { %871 = vmatprep.subr.bf16.mxu0 %v1072_v0  ;;  %937 = vmatprep.subr.bf16.mxu1 %v1072_v0  ;;  %v95_v51 = vld [vmem:[#allocation2 + $0x108] sm:$0xff]  ;;  %v96_v54 = vld [vmem:[#allocation2 + $0x110] sm:$0xff]  ;;  %v105_v61 = vld [vmem:[#allocation2 + $0x158] sm:$0xff] }
  0x54   :  { %v99_v55 = vld [vmem:[#allocation2 + $0x128] sm:$0xff]  ;;  %v104_v62 = vld [vmem:[#allocation2 + $0x150] sm:$0xff]  ;;  %v437_v5 = vld [vmem:[#allocation7 + $0x78] sm:$0xff] }
  0x55   :  { %v436_v4 = vld [vmem:[#allocation7 + $0x70] sm:$0xff] }
  0x56   :  { %873 = vmatpush1.bf16.msra.mxu0 %v872_v26  ;;  %953 = vmatpush1.bf16.msra.mxu1 %v872_v26  ;;  %v75_v26 = vld [vmem:[#allocation2 + $0x68] sm:$0xff] }
  0x57   :  { %874 = vmatprep.subr.bf16.mxu0 %v1072_v0  ;;  %938 = vmatprep.subr.bf16.mxu1 %v1072_v0 }
  0x5a   :  { %876 = vmatpush1.bf16.msra.mxu0 %v875_v29  ;;  %954 = vmatpush1.bf16.msra.mxu1 %v875_v29  ;;  %v74_v29 = vld [vmem:[#allocation2 + $0x60] sm:$0xff] }
  0x5b   :  { %877 = vmatprep.subr.bf16.mxu0 %v1072_v0  ;;  %939 = vmatprep.subr.bf16.mxu1 %v1072_v0 }
  0x5e   :  { %879 = vmatpush1.bf16.msra.mxu0 %v878_v32  ;;  %955 = vmatpush1.bf16.msra.mxu1 %v878_v32  ;;  %v125_v32 = vld [vmem:[#allocation2 + $0x1f8] sm:$0xff] }
  0x5f   :  { %880 = vmatprep.subr.bf16.mxu0 %v1072_v0  ;;  %940 = vmatprep.subr.bf16.mxu1 %v1072_v0 }
  0x62   :  { %882 = vmatpush1.bf16.msra.mxu0 %v881_v35  ;;  %956 = vmatpush1.bf16.msra.mxu1 %v881_v35  ;;  %v124_v35 = vld [vmem:[#allocation2 + $0x1f0] sm:$0xff] }
  0x63   :  { %883 = vmatprep.subr.bf16.mxu0 %v1072_v0  ;;  %941 = vmatprep.subr.bf16.mxu1 %v1072_v0 }
  0x66   :  { %885 = vmatpush1.bf16.msra.mxu0 %v884_v38  ;;  %957 = vmatpush1.bf16.msra.mxu1 %v884_v38  ;;  %v80_v38 = vld [vmem:[#allocation2 + $0x90] sm:$0xff] }
  0x67   :  { %886 = vmatprep.subr.bf16.mxu0 %v1072_v0  ;;  %942 = vmatprep.subr.bf16.mxu1 %v1072_v0 }
  0x6a   :  { %888 = vmatpush1.bf16.msra.mxu0 %v887_v41  ;;  %958 = vmatpush1.bf16.msra.mxu1 %v887_v41  ;;  %v85_v41 = vld [vmem:[#allocation2 + $0xb8] sm:$0xff] }
  0x6b   :  { %889 = vmatprep.subr.bf16.mxu0 %v1072_v0  ;;  %943 = vmatprep.subr.bf16.mxu1 %v1072_v0 }
  0x6e   :  { %891 = vmatpush1.bf16.msra.mxu0 %v890_v44  ;;  %959 = vmatpush1.bf16.msra.mxu1 %v890_v44  ;;  %v86_v44 = vld [vmem:[#allocation2 + $0xc0] sm:$0xff] }
  0x6f   :  { %892 = vmatprep.subr.bf16.mxu0 %v1072_v0  ;;  %944 = vmatprep.subr.bf16.mxu1 %v1072_v0 }
  0x72   :  { %894 = vmatpush1.bf16.msra.mxu0 %v893_v47  ;;  %960 = vmatpush1.bf16.msra.mxu1 %v893_v47  ;;  %v91_v47 = vld [vmem:[#allocation2 + $0xe8] sm:$0xff] }
  0x73   :  { %895 = vmatprep.subr.bf16.mxu0 %v1072_v0  ;;  %945 = vmatprep.subr.bf16.mxu1 %v1072_v0  ;;  %v112_v0 = vld [vmem:[#allocation2 + $0x190] sm:$0xff] }
  0x76   :  { %897 = vmatpush1.bf16.msra.mxu0 %v896_v52  ;;  %961 = vmatpush1.bf16.msra.mxu1 %v896_v52  ;;  %v94_v52 = vld [vmem:[#allocation2 + $0x100] sm:$0xff] }
  0x77   :  { %899 = vmatprep.subr.bf16.mxu1 %v898_v53 }
  0x79   :  { %230 = vmatmul.mubr.f32.vlgmr.msra.gmra.mrb[0].mxu0 %v62_v56  ;;  %350 = vmatmul.mubr.f32.vlgmr.msra.gmra.mrb[0].mxu1 %v110_v58  ;;  %v98_v56 = vld [vmem:[#allocation2 + $0x120] sm:$0xff]  ;;  %v100_v58 = vld [vmem:[#allocation2 + $0x130] sm:$0xff] }
  0x7a   :  { %234 = vmatprep.mubr.f32.mxu0 %v65_v57  ;;  %354 = vmatprep.mubr.f32.mxu1 %v113_v59  ;;  %v101_v57 = vld [vmem:[#allocation2 + $0x138] sm:$0xff]  ;;  %v103_v59 = vld [vmem:[#allocation2 + $0x148] sm:$0xff] }
  0x7b   :  { %901 = vmatpush3.bf16.msra.mxu1 %v898_v53  ;;  %v97_v53 = vld [vmem:[#allocation2 + $0x118] sm:$0xff] }
  0x7c   :  { %903 = vmatprep.subr.bf16.mxu1 %v902_v60 }
  0x7d   :  { %235 = vmatmul.mubr.f32.gmra.mrb[2].mxu0 %v64_v63  ;;  %355 = vmatmul.mubr.f32.gmra.mrb[2].mxu1 %v112_v0  ;;  %v434_v63 = vld [vmem:[#allocation7 + $0x60] sm:$0xff]  ;;  %v107_v0 = vld [vmem:[#allocation2 + $0x168] sm:$0xff] }
  0x7e   :  { %239 = vmatprep.mubr.f32.mxu0 %v67_v1  ;;  %359 = vmatprep.mubr.f32.mxu1 %v115_v2  ;;  %v435_v1 = vld [vmem:[#allocation7 + $0x68] sm:$0xff] }
  0x7f   :  { %905 = vmatpush3.bf16.msra.mxu1 %v902_v60  ;;  %v102_v60 = vld [vmem:[#allocation2 + $0x140] sm:$0xff]  ;;  %v922_v2 = vpack.c.bf16 %v435_v1, %v434_v63 }
  0x80   :  { %907 = vmatprep.subr.bf16.mxu1 %v906_v3 }
  0x81   :  { %240 = vmatmul.mubr.f32.gmra.mrb[4].mxu0 %v66_v6  ;;  %360 = vmatmul.mubr.f32.gmra.mrb[4].mxu1 %v114_v8  ;;  %v109_v6 = vld [vmem:[#allocation2 + $0x178] sm:$0xff]  ;;  %v108_v8 = vld [vmem:[#allocation2 + $0x170] sm:$0xff] }
  0x82   :  { %244 = vmatprep.mubr.f32.mxu0 %v69_v7  ;;  %364 = vmatprep.mubr.f32.mxu1 %v117_v9  ;;  %v926_v7 = vpack.c.bf16 %v437_v5, %v436_v4  ;;  %v1181_v9 = vld [vmem:[%s1293_s2] ss:$0 sm:$0xff] }
  0x83   :  { %909 = vmatpush3.bf16.msra.mxu1 %v906_v3  ;;  %v106_v3 = vld [vmem:[#allocation2 + $0x160] sm:$0xff] }
  0x84   :  { %911 = vmatprep.subr.bf16.mxu1 %v910_v10 }
  0x85   :  { %245 = vmatmul.mubr.f32.gmra.mrb[6].mxu0 %v68_v13  ;;  %365 = vmatmul.mubr.f32.gmra.mrb[6].mxu1 %v116_v15 }
  0x86   :  { %249 = vmatprep.mubr.f32.mxu0 %v71_v14  ;;  %369 = vmatprep.mubr.f32.mxu1 %v119_v16 }
  0x87   :  { %913 = vmatpush3.bf16.msra.mxu1 %v910_v10 }
  0x88   :  { %915 = vmatprep.subr.bf16.mxu1 %v914_v17 }
  0x89   :  { %250 = vmatmul.mubr.f32.gmra.mrb[8].mxu0 %v70_v20  ;;  %370 = vmatmul.mubr.f32.gmra.mrb[8].mxu1 %v118_v22 }
  0x8a   :  { %254 = vmatprep.mubr.f32.mxu0 %v73_v21  ;;  %374 = vmatprep.mubr.f32.mxu1 %v121_v23 }
  0x8b   :  { %917 = vmatpush3.bf16.msra.mxu1 %v914_v17 }
  0x8c   :  { %919 = vmatprep.subr.bf16.mxu1 %v918_v24 }
  0x8d   :  { %255 = vmatmul.mubr.f32.gmra.mrb[10].mxu0 %v72_v25  ;;  %375 = vmatmul.mubr.f32.gmra.mrb[10].mxu1 %v120_v27 }
  0x8e   :  { %259 = vmatprep.mubr.f32.mxu0 %v75_v26  ;;  %379 = vmatprep.mubr.f32.mxu1 %v123_v28 }
  0x8f   :  { %921 = vmatpush3.bf16.msra.mxu1 %v918_v24 }
  0x90   :  { %923 = vmatprep.subr.bf16.mxu1 %v922_v2 }
  0x91   :  { %260 = vmatmul.mubr.f32.gmra.mrb[12].mxu0 %v74_v29  ;;  %380 = vmatmul.mubr.f32.gmra.mrb[12].mxu1 %v122_v31 }
  0x92   :  { %264 = vmatprep.mubr.f32.mxu0 %v77_v30  ;;  %384 = vmatprep.mubr.f32.mxu1 %v125_v32 }
  0x93   :  { %925 = vmatpush3.bf16.msra.mxu1 %v922_v2 }
  0x94   :  { %927 = vmatprep.subr.bf16.mxu1 %v926_v7 }
  0x95   :  { %265 = vmatmul.mubr.f32.gmra.mrb[14].mxu0 %v76_v33  ;;  %385 = vmatmul.mubr.f32.gmra.mrb[14].mxu1 %v124_v35 }
  0x96   :  { %269 = vmatprep.mubr.f32.mxu0 %v79_v34 }
  0x97   :  { %929 = vmatpush3.bf16.msra.mxu1 %v926_v7 }
  0x99   :  { %270 = vmatmul.mubr.f32.gmra.mrb[16].mxu0 %v78_v36 }
  0x9a   :  { %274 = vmatprep.mubr.f32.mxu0 %v81_v37 }
  0x9d   :  { %275 = vmatmul.mubr.f32.gmra.mrb[18].mxu0 %v80_v38 }
  0x9e   :  { %279 = vmatprep.mubr.f32.mxu0 %v83_v39 }
  0xa1   :  { %280 = vmatmul.mubr.f32.gmra.mrb[20].mxu0 %v82_v40 }
  0xa2   :  { %284 = vmatprep.mubr.f32.mxu0 %v85_v41 }
  0xa5   :  { %285 = vmatmul.mubr.f32.gmra.mrb[22].mxu0 %v84_v42 }
  0xa6   :  { %289 = vmatprep.mubr.f32.mxu0 %v87_v43 }
  0xa9   :  { %290 = vmatmul.mubr.f32.gmra.mrb[24].mxu0 %v86_v44 }
  0xaa   :  { %294 = vmatprep.mubr.f32.mxu0 %v89_v45 }
  0xad   :  { %295 = vmatmul.mubr.f32.gmra.mrb[26].mxu0 %v88_v46 }
  0xae   :  { %299 = vmatprep.mubr.f32.mxu0 %v91_v47 }
  0xb1   :  { %300 = vmatmul.mubr.f32.gmra.mrb[28].mxu0 %v90_v48 }
  0xb2   :  { %304 = vmatprep.mubr.f32.mxu0 %v93_v49 }
  0xb5   :  { %305 = vmatmul.mubr.f32.gmra.mrb[30].mxu0 %v92_v50 }
  0xb6   :  { %309 = vmatprep.mubr.f32.mxu0 %v95_v51 }
  0xb9   :  { %310 = vmatmul.mubr.f32.gmra.mrb[32].mxu0 %v94_v52 }
  0xba   :  { %314 = vmatprep.mubr.f32.mxu0 %v97_v53 }
  0xbd   :  { %315 = vmatmul.mubr.f32.gmra.mrb[34].mxu0 %v96_v54 }
  0xbe   :  { %319 = vmatprep.mubr.f32.mxu0 %v99_v55 }
  0xc1   :  { %320 = vmatmul.mubr.f32.gmra.mrb[36].mxu0 %v98_v56 }
  0xc2   :  { %324 = vmatprep.mubr.f32.mxu0 %v101_v57 }
  0xc5   :  { %325 = vmatmul.mubr.f32.gmra.mrb[38].mxu0 %v100_v58 }
  0xc6   :  { %329 = vmatprep.mubr.f32.mxu0 %v103_v59 }
  0xc9   :  { %330 = vmatmul.mubr.f32.gmra.mrb[40].mxu0 %v102_v60 }
  0xca   :  { %334 = vmatprep.mubr.f32.mxu0 %v105_v61 }
  0xcd   :  { %335 = vmatmul.mubr.f32.gmra.mrb[42].mxu0 %v104_v62 }
  0xce   :  { %339 = vmatprep.mubr.f32.mxu0 %v107_v0 }
  0xd1   :  { %340 = vmatmul.mubr.f32.gmra.mrb[44].mxu0 %v106_v3 }
  0xd2   :  { %344 = vmatprep.mubr.f32.mxu0 %v109_v6 }
  0xd5   :  { %345 = vmatmul.mubr.f32.gmra.mrb[46].mxu0 %v108_v8 }
 0x14c   :  { %v231_v10 = vpop.f32.mrb[0].mxu0  ;;  %v1184_v13 = vpop.f32.mrb[0].mxu1 }
 0x14d   :  { %v232_v11 = vadd.f32 %v1181_v9, %v231_v10  ;;  %v233_v12 = vpop.f32.mrb[1].mxu0  ;;  %v353_v14 = vpop.f32.mrb[1].mxu1 }
 0x14f   :  { %v390_v15 = vmax.f32 %v232_v11, 0.0 }
 0x150   :  { %v236_v16 = vpop.f32.mrb[2].mxu0  ;;  %v1187_v19 = vpop.f32.mrb[2].mxu1 }
 0x151   :  { %v237_v17 = vadd.f32 %v1181_v9, %v236_v16  ;;  %v238_v18 = vpop.f32.mrb[3].mxu0  ;;  %802 = vmatprep.mubr.f32.mxu1 %v390_v15  ;;  %v358_v20 = vpop.f32.mrb[3].mxu1 }
 0x153   :  { %v391_v21 = vmax.f32 %v237_v17, 0.0 }
 0x154   :  { %v241_v22 = vpop.f32.mrb[4].mxu0  ;;  %v1190_v25 = vpop.f32.mrb[4].mxu1 }
 0x155   :  { %v242_v23 = vadd.f32 %v1181_v9, %v241_v22  ;;  %v243_v24 = vpop.f32.mrb[5].mxu0  ;;  %803 = vmatmul.mubr.f32.vlgmr.msra.gmra.mrb[16].mxu1 %v391_v21  ;;  %v363_v26 = vpop.f32.mrb[5].mxu1 }
 0x157   :  { %v392_v27 = vmax.f32 %v242_v23, 0.0 }
 0x158   :  { %v246_v28 = vpop.f32.mrb[6].mxu0  ;;  %v1193_v31 = vpop.f32.mrb[6].mxu1 }
 0x159   :  { %v247_v29 = vadd.f32 %v1181_v9, %v246_v28  ;;  %v248_v30 = vpop.f32.mrb[7].mxu0  ;;  %805 = vmatprep.mubr.f32.mxu1 %v392_v27  ;;  %v368_v32 = vpop.f32.mrb[7].mxu1 }
 0x15b   :  { %v393_v33 = vmax.f32 %v247_v29, 0.0 }
 0x15c   :  { %v251_v34 = vpop.f32.mrb[8].mxu0  ;;  %v1196_v37 = vpop.f32.mrb[8].mxu1 }
 0x15d   :  { %v252_v35 = vadd.f32 %v1181_v9, %v251_v34  ;;  %v253_v36 = vpop.f32.mrb[9].mxu0  ;;  %806 = vmatmul.mubr.f32.gmra.mrb[18].mxu1 %v393_v33  ;;  %v373_v38 = vpop.f32.mrb[9].mxu1 }
 0x15f   :  { %v394_v39 = vmax.f32 %v252_v35, 0.0 }
 0x160   :  { %v256_v40 = vpop.f32.mrb[10].mxu0  ;;  %v1199_v43 = vpop.f32.mrb[10].mxu1 }
 0x161   :  { %v257_v41 = vadd.f32 %v1181_v9, %v256_v40  ;;  %v258_v42 = vpop.f32.mrb[11].mxu0  ;;  %808 = vmatprep.mubr.f32.mxu1 %v394_v39  ;;  %v378_v44 = vpop.f32.mrb[11].mxu1 }
 0x163   :  { %v395_v45 = vmax.f32 %v257_v41, 0.0 }
 0x164   :  { %v261_v46 = vpop.f32.mrb[12].mxu0  ;;  %v1202_v49 = vpop.f32.mrb[12].mxu1 }
 0x165   :  { %v262_v47 = vadd.f32 %v1181_v9, %v261_v46  ;;  %v263_v48 = vpop.f32.mrb[13].mxu0  ;;  %809 = vmatmul.mubr.f32.gmra.mrb[20].mxu1 %v395_v45  ;;  %v383_v50 = vpop.f32.mrb[13].mxu1 }
 0x167   :  { %v396_v51 = vmax.f32 %v262_v47, 0.0 }
 0x168   :  { %v266_v52 = vpop.f32.mrb[14].mxu0  ;;  %v1205_v55 = vpop.f32.mrb[14].mxu1 }
 0x169   :  { %v267_v53 = vadd.f32 %v1181_v9, %v266_v52  ;;  %v268_v54 = vpop.f32.mrb[15].mxu0  ;;  %811 = vmatprep.mubr.f32.mxu1 %v396_v51  ;;  %v388_v56 = vpop.f32.mrb[15].mxu1 }
 0x16b   :  { %v397_v57 = vmax.f32 %v267_v53, 0.0 }
 0x16c   :  { %v271_v58 = vpop.f32.mrb[16].mxu0 }
 0x16d   :  { %v272_v59 = vadd.f32 %v1181_v9, %v271_v58  ;;  %v273_v60 = vpop.f32.mrb[17].mxu0  ;;  %812 = vmatmul.mubr.f32.gmra.mrb[22].mxu1 %v397_v57 }
 0x16f   :  { %v398_v61 = vmax.f32 %v272_v59, 0.0 }
 0x170   :  { %v276_v62 = vpop.f32.mrb[18].mxu0 }
 0x171   :  { %v277_v63 = vadd.f32 %v1181_v9, %v276_v62  ;;  %v278_v1 = vpop.f32.mrb[19].mxu0  ;;  %814 = vmatprep.mubr.f32.mxu1 %v398_v61 }
 0x173   :  { %v399_v0 = vmax.f32 %v277_v63, 0.0  ;;  %v352_v63 = vadd.f32 %v1181_v9, %v1184_v13 }
 0x174   :  { %v281_v2 = vpop.f32.mrb[20].mxu0 }
 0x175   :  { %v282_v3 = vadd.f32 %v1181_v9, %v281_v2  ;;  %v283_v4 = vpop.f32.mrb[21].mxu0  ;;  %815 = vmatmul.mubr.f32.gmra.mrb[24].mxu1 %v399_v0 }
 0x177   :  { %v400_v5 = vmax.f32 %v282_v3, 0.0  ;;  %v357_v3 = vadd.f32 %v1181_v9, %v1187_v19  ;;  %v382_v19 = vadd.f32 %v1181_v9, %v1202_v49 }
 0x178   :  { %v286_v6 = vpop.f32.mrb[22].mxu0 }
 0x179   :  { %v287_v7 = vadd.f32 %v1181_v9, %v286_v6  ;;  %v288_v8 = vpop.f32.mrb[23].mxu0  ;;  %817 = vmatprep.mubr.f32.mxu1 %v400_v5  ;;  %v414_v5 = vmax.f32 %v352_v63, 0.0  ;;  %v362_v6 = vadd.f32 %v1181_v9, %v1190_v25 }
 0x17a   :  { %v367_v8 = vadd.f32 %v1181_v9, %v1193_v31 }
 0x17b   :  { %v401_v10 = vmax.f32 %v287_v7, 0.0  ;;  %v415_v7 = vmax.f32 %v357_v3, 0.0  ;;  %v416_v13 = vmax.f32 %v362_v6, 0.0 }
 0x17c   :  { %v291_v11 = vpop.f32.mrb[24].mxu0 }
 0x17d   :  { %v292_v12 = vadd.f32 %v1181_v9, %v291_v11  ;;  %v293_v14 = vpop.f32.mrb[25].mxu0  ;;  %818 = vmatmul.mubr.f32.gmra.mrb[26].mxu1 %v401_v10  ;;  %v372_v10 = vadd.f32 %v1181_v9, %v1196_v37  ;;  %v417_v11 = vmax.f32 %v367_v8, 0.0  ;;  %v1242_v37 = vld [vmem:[%s1295_s4] ss:$0 sm:$0xff]  ;;  %s1073_s4 = smov [#allocation8]  }
 0x17e   :  { %v387_v14 = vadd.f32 %v1181_v9, %v1205_v55  ;;  %s707_s10 = sshll.u32 %s1073_s4, 4  ;;  %s708_s10 = int_to_ptr.vmem [resolvable:$true] %s707_s10 }
 0x17f   :  { %v402_v15 = vmax.f32 %v292_v12, 0.0  ;;  %v377_v12 = vadd.f32 %v1181_v9, %v1199_v43  ;;  %v418_v25 = vmax.f32 %v372_v10, 0.0  ;;  %s1037_s11 = scalar_lea.vmem %s708_s10, 4096  ;;  %p1042_p11 = scmp.lt.s32.totalorder %s708_s10, %s708_s10 }
 0x180   :  { %v296_v16 = vpop.f32.mrb[26].mxu0  ;;  %p1038_p10 = scmp.ne.s32.totalorder %s708_s10, %s1037_s11  ;;  %p1043_p12 = scmp.lt.s32.totalorder %s1037_s11, %s1037_s11 }
 0x181   :  { %v297_v17 = vadd.f32 %v1181_v9, %v296_v16  ;;  %v298_v18 = vpop.f32.mrb[27].mxu0  ;;  %820 = vmatprep.mubr.f32.mxu1 %v402_v15  ;;  %v420_v15 = vmax.f32 %v382_v19, 0.0  ;;  %v419_v31 = vmax.f32 %v377_v12, 0.0  ;;  %v421_v16 = vmax.f32 %v387_v14, 0.0 }
 0x182   :  { %p1044_p13 = por %p1043_p12, %p1042_p11 }
 0x183   :  { %v403_v20 = vmax.f32 %v297_v17, 0.0 }
 0x184   :  { %v301_v21 = vpop.f32.mrb[28].mxu0  ;;  %p1045_p0 = pnand %p1044_p13, %p1038_p10 }
 0x185   :  { %v302_v22 = vadd.f32 %v1181_v9, %v301_v21  ;;  %v303_v23 = vpop.f32.mrb[29].mxu0  ;;  %821 = vmatmul.mubr.f32.gmra.mrb[28].mxu1 %v403_v20 }
 0x187   :  { %v404_v24 = vmax.f32 %v302_v22, 0.0 }
 0x188   :  { %v306_v26 = vpop.f32.mrb[30].mxu0 }
 0x189   :  { %v307_v27 = vadd.f32 %v1181_v9, %v306_v26  ;;  %v308_v28 = vpop.f32.mrb[31].mxu0  ;;  %823 = vmatprep.mubr.f32.mxu1 %v404_v24 }
 0x18b   :  { %v405_v29 = vmax.f32 %v307_v27, 0.0 }
 0x18c   :  { %v311_v30 = vpop.f32.mrb[32].mxu0 }
 0x18d   :  { %v312_v32 = vadd.f32 %v1181_v9, %v311_v30  ;;  %v313_v33 = vpop.f32.mrb[33].mxu0  ;;  %824 = vmatmul.mubr.f32.gmra.mrb[30].mxu1 %v405_v29 }
 0x18f   :  { %v406_v34 = vmax.f32 %v312_v32, 0.0 }
 0x190   :  { %v316_v35 = vpop.f32.mrb[34].mxu0 }
 0x191   :  { %v317_v36 = vadd.f32 %v1181_v9, %v316_v35  ;;  %v318_v38 = vpop.f32.mrb[35].mxu0  ;;  %826 = vmatprep.mubr.f32.mxu1 %v406_v34 }
 0x193   :  { %v407_v39 = vmax.f32 %v317_v36, 0.0 }
 0x194   :  { %v321_v40 = vpop.f32.mrb[36].mxu0 }
 0x195   :  { %v322_v41 = vadd.f32 %v1181_v9, %v321_v40  ;;  %v323_v42 = vpop.f32.mrb[37].mxu0  ;;  %827 = vmatmul.mubr.f32.gmra.mrb[32].mxu1 %v407_v39 }
 0x197   :  { %v408_v44 = vmax.f32 %v322_v41, 0.0 }
 0x198   :  { %v326_v45 = vpop.f32.mrb[38].mxu0 }
 0x199   :  { %v327_v46 = vadd.f32 %v1181_v9, %v326_v45  ;;  %v328_v47 = vpop.f32.mrb[39].mxu0  ;;  %829 = vmatprep.mubr.f32.mxu1 %v408_v44 }
 0x19b   :  { %v409_v48 = vmax.f32 %v327_v46, 0.0 }
 0x19c   :  { %v331_v50 = vpop.f32.mrb[40].mxu0 }
 0x19d   :  { %v332_v51 = vadd.f32 %v1181_v9, %v331_v50  ;;  %v333_v52 = vpop.f32.mrb[41].mxu0  ;;  %830 = vmatmul.mubr.f32.gmra.mrb[34].mxu1 %v409_v48 }
 0x19f   :  { %v410_v53 = vmax.f32 %v332_v51, 0.0 }
 0x1a0   :  { %v336_v54 = vpop.f32.mrb[42].mxu0 }
 0x1a1   :  { %v337_v56 = vadd.f32 %v1181_v9, %v336_v54  ;;  %v338_v57 = vpop.f32.mrb[43].mxu0  ;;  %832 = vmatprep.mubr.f32.mxu1 %v410_v53 }
 0x1a3   :  { %v411_v58 = vmax.f32 %v337_v56, 0.0 }
 0x1a4   :  { %v341_v59 = vpop.f32.mrb[44].mxu0 }
 0x1a5   :  { %v342_v60 = vadd.f32 %v1181_v9, %v341_v59  ;;  %v343_v61 = vpop.f32.mrb[45].mxu0  ;;  %833 = vmatmul.mubr.f32.gmra.mrb[36].mxu1 %v411_v58 }
 0x1a7   :  { %v412_v62 = vmax.f32 %v342_v60, 0.0 }
 0x1a8   :  { %v346_v1 = vpop.f32.mrb[46].mxu0 }
 0x1a9   :  { %v347_v0 = vadd.f32 %v1181_v9, %v346_v1  ;;  %v348_v2 = vpop.f32.mrb[47].mxu0  ;;  %835 = vmatprep.mubr.f32.mxu1 %v412_v62 }
 0x1ab   :  { %v413_v4 = vmax.f32 %v347_v0, 0.0 }
 0x1ad   :  { %836 = vmatmul.mubr.f32.gmra.mrb[38].mxu1 %v413_v4 }
 0x1ae   :  { %838 = vmatprep.mubr.f32.mxu1 %v414_v5 }
 0x1b1   :  { %839 = vmatmul.mubr.f32.gmra.mrb[40].mxu1 %v415_v7 }
 0x1b2   :  { %841 = vmatprep.mubr.f32.mxu1 %v416_v13 }
 0x1b5   :  { %842 = vmatmul.mubr.f32.gmra.mrb[42].mxu1 %v417_v11 }
 0x1b6   :  { %844 = vmatprep.mubr.f32.mxu1 %v418_v25 }
 0x1b9   :  { %845 = vmatmul.mubr.f32.gmra.mrb[44].mxu1 %v419_v31 }
 0x1ba   :  { %847 = vmatprep.mubr.f32.mxu1 %v420_v15 }
 0x1bd   :  { %848 = vmatmul.mubr.f32.gmra.mrb[46].mxu1 %v421_v16 }
 0x228   :  { %v804_v49 = vpop.f32.mrb[16].mxu1 }
 0x229   :  { %v517_v43 = vadd.f32 %v804_v49, %v1242_v37  ;;  %v511_v17 = vpop.f32.mrb[17].mxu1 }
 0x22a   :  { %v512_v18 = vadd.f32 %v1242_v37, %v511_v17 }
 0x22b   :  { %671 = vst [vmem:[#allocation8 + $0x8] sm:$0xff] %v517_v43 }
 0x22c   :  { %670 = vst [vmem:[#allocation8] sm:$0xff] %v512_v18 }
 0x230   :  { %v807_v9 = vpop.f32.mrb[18].mxu1 }
 0x231   :  { %v527_v55 = vadd.f32 %v807_v9, %v1242_v37  ;;  %v521_v20 = vpop.f32.mrb[19].mxu1 }
 0x232   :  { %v522_v21 = vadd.f32 %v1242_v37, %v521_v20 }
 0x233   :  { %673 = vst [vmem:[#allocation8 + $0x18] sm:$0xff] %v527_v55 }
 0x234   :  { %672 = vst [vmem:[#allocation8 + $0x10] sm:$0xff] %v522_v21 }
 0x238   :  { %v810_v22 = vpop.f32.mrb[20].mxu1 }
 0x239   :  { %v537_v23 = vadd.f32 %v810_v22, %v1242_v37  ;;  %v531_v24 = vpop.f32.mrb[21].mxu1 }
 0x23a   :  { %v532_v26 = vadd.f32 %v1242_v37, %v531_v24 }
 0x23b   :  { %675 = vst [vmem:[#allocation8 + $0x28] sm:$0xff] %v537_v23 }
 0x23c   :  { %674 = vst [vmem:[#allocation8 + $0x20] sm:$0xff] %v532_v26 }
 0x240   :  { %v813_v27 = vpop.f32.mrb[22].mxu1 }
 0x241   :  { %v547_v28 = vadd.f32 %v813_v27, %v1242_v37  ;;  %v541_v29 = vpop.f32.mrb[23].mxu1 }
 0x242   :  { %v542_v30 = vadd.f32 %v1242_v37, %v541_v29 }
 0x243   :  { %677 = vst [vmem:[#allocation8 + $0x38] sm:$0xff] %v547_v28 }
 0x244   :  { %676 = vst [vmem:[#allocation8 + $0x30] sm:$0xff] %v542_v30 }
 0x248   :  { %v816_v32 = vpop.f32.mrb[24].mxu1 }
 0x249   :  { %v557_v33 = vadd.f32 %v816_v32, %v1242_v37  ;;  %v551_v34 = vpop.f32.mrb[25].mxu1 }
 0x24a   :  { %v552_v35 = vadd.f32 %v1242_v37, %v551_v34 }
 0x24b   :  { %679 = vst [vmem:[#allocation8 + $0x48] sm:$0xff] %v557_v33 }
 0x24c   :  { %678 = vst [vmem:[#allocation8 + $0x40] sm:$0xff] %v552_v35 }
 0x250   :  { %v819_v36 = vpop.f32.mrb[26].mxu1 }
 0x251   :  { %v567_v38 = vadd.f32 %v819_v36, %v1242_v37  ;;  %v561_v39 = vpop.f32.mrb[27].mxu1 }
 0x252   :  { %v562_v40 = vadd.f32 %v1242_v37, %v561_v39 }
 0x253   :  { %681 = vst [vmem:[#allocation8 + $0x58] sm:$0xff] %v567_v38 }
 0x254   :  { %680 = vst [vmem:[#allocation8 + $0x50] sm:$0xff] %v562_v40 }
 0x258   :  { %v822_v41 = vpop.f32.mrb[28].mxu1 }
 0x259   :  { %v577_v42 = vadd.f32 %v822_v41, %v1242_v37  ;;  %v571_v44 = vpop.f32.mrb[29].mxu1 }
 0x25a   :  { %v572_v45 = vadd.f32 %v1242_v37, %v571_v44 }
 0x25b   :  { %683 = vst [vmem:[#allocation8 + $0x68] sm:$0xff] %v577_v42 }
 0x25c   :  { %682 = vst [vmem:[#allocation8 + $0x60] sm:$0xff] %v572_v45 }
 0x260   :  { %v825_v46 = vpop.f32.mrb[30].mxu1 }
 0x261   :  { %v587_v47 = vadd.f32 %v825_v46, %v1242_v37  ;;  %v581_v48 = vpop.f32.mrb[31].mxu1 }
 0x262   :  { %v582_v50 = vadd.f32 %v1242_v37, %v581_v48 }
 0x263   :  { %685 = vst [vmem:[#allocation8 + $0x78] sm:$0xff] %v587_v47 }
 0x264   :  { %684 = vst [vmem:[#allocation8 + $0x70] sm:$0xff] %v582_v50 }
 0x268   :  { %v828_v51 = vpop.f32.mrb[32].mxu1 }
 0x269   :  { %v597_v52 = vadd.f32 %v828_v51, %v1242_v37  ;;  %v591_v53 = vpop.f32.mrb[33].mxu1 }
 0x26a   :  { %v592_v54 = vadd.f32 %v1242_v37, %v591_v53 }
 0x26b   :  { %687 = vst [vmem:[#allocation8 + $0x88] sm:$0xff] %v597_v52 }
 0x26c   :  { %686 = vst [vmem:[#allocation8 + $0x80] sm:$0xff] %v592_v54 }
 0x270   :  { %v831_v56 = vpop.f32.mrb[34].mxu1 }
 0x271   :  { %v607_v57 = vadd.f32 %v831_v56, %v1242_v37  ;;  %v601_v58 = vpop.f32.mrb[35].mxu1 }
 0x272   :  { %v602_v59 = vadd.f32 %v1242_v37, %v601_v58 }
 0x273   :  { %689 = vst [vmem:[#allocation8 + $0x98] sm:$0xff] %v607_v57 }
 0x274   :  { %688 = vst [vmem:[#allocation8 + $0x90] sm:$0xff] %v602_v59 }
 0x278   :  { %v834_v60 = vpop.f32.mrb[36].mxu1 }
 0x279   :  { %v617_v61 = vadd.f32 %v834_v60, %v1242_v37  ;;  %v611_v62 = vpop.f32.mrb[37].mxu1 }
 0x27a   :  { %v612_v63 = vadd.f32 %v1242_v37, %v611_v62 }
 0x27b   :  { %691 = vst [vmem:[#allocation8 + $0xa8] sm:$0xff] %v617_v61 }
 0x27c   :  { %690 = vst [vmem:[#allocation8 + $0xa0] sm:$0xff] %v612_v63 }
 0x280   :  { %v837_v1 = vpop.f32.mrb[38].mxu1 }
 0x281   :  { %v627_v0 = vadd.f32 %v837_v1, %v1242_v37  ;;  %v621_v2 = vpop.f32.mrb[39].mxu1 }
 0x282   :  { %v622_v3 = vadd.f32 %v1242_v37, %v621_v2 }
 0x283   :  { %693 = vst [vmem:[#allocation8 + $0xb8] sm:$0xff] %v627_v0 }
 0x284   :  { %692 = vst [vmem:[#allocation8 + $0xb0] sm:$0xff] %v622_v3  ;;  %v840_v4 = vpop.f32.mrb[40].mxu1 }
 0x285   :  { %v637_v5 = vadd.f32 %v840_v4, %v1242_v37  ;;  %v631_v6 = vpop.f32.mrb[41].mxu1 }
 0x286   :  { %v632_v7 = vadd.f32 %v1242_v37, %v631_v6 }
 0x287   :  { %695 = vst [vmem:[#allocation8 + $0xc8] sm:$0xff] %v637_v5 }
 0x288   :  { %694 = vst [vmem:[#allocation8 + $0xc0] sm:$0xff] %v632_v7  ;;  %v843_v8 = vpop.f32.mrb[42].mxu1 }
 0x289   :  { %v647_v13 = vadd.f32 %v843_v8, %v1242_v37  ;;  %v641_v10 = vpop.f32.mrb[43].mxu1 }
 0x28a   :  { %v642_v19 = vadd.f32 %v1242_v37, %v641_v10 }
 0x28b   :  { %697 = vst [vmem:[#allocation8 + $0xd8] sm:$0xff] %v647_v13 }
 0x28c   :  { %696 = vst [vmem:[#allocation8 + $0xd0] sm:$0xff] %v642_v19  ;;  %v846_v11 = vpop.f32.mrb[44].mxu1 }
 0x28d   :  { %v657_v12 = vadd.f32 %v846_v11, %v1242_v37  ;;  %v651_v25 = vpop.f32.mrb[45].mxu1 }
 0x28e   :  { %v652_v14 = vadd.f32 %v1242_v37, %v651_v25 }
 0x28f   :  { %699 = vst [vmem:[#allocation8 + $0xe8] sm:$0xff] %v657_v12 }
 0x290   :  { %698 = vst [vmem:[#allocation8 + $0xe0] sm:$0xff] %v652_v14  ;;  %v849_v15 = vpop.f32.mrb[46].mxu1 }
 0x291   :  { %v667_v31 = vadd.f32 %v849_v15, %v1242_v37  ;;  %v661_v16 = vpop.f32.mrb[47].mxu1 }
 0x292   :  { %v662_v49 = vadd.f32 %v1242_v37, %v661_v16 }
 0x293   :  { %701 = vst [vmem:[#allocation8 + $0xf8] sm:$0xff] %v667_v31 }
 0x294   :  { %700 = vst [vmem:[#allocation8 + $0xf0] sm:$0xff] %v662_v49 }
 0x295   :  { %1048 = shalt.err (!%p1045_p0)
}
 0x296   :  { %s1049_s14 = scalar_lea.hbm %s1296_s5, 4096 }
 0x297   :  { %p1050_p1 = scmp.ne.s32.totalorder %s1296_s5, %s1049_s14  ;;  %p1053_p2 = scmp.lt.u32.totalorder %s1049_s14, %s1296_s5 }
 0x299   :  { %p1055_p3 = pnand %p1053_p2, %p1050_p1 }
 0x29b   :  { %1058 = shalt.err (!%p1055_p3)
}
 0x29c   :  { %713 = dma.vmem_to_hbm [thread:$0]  %s708_s10, 4096, %s1296_s5, [#allocation4], %s1066_s28, %s1066_s28, %s1067_s29  }
 0x29d   :  { %1063 = dma.done.wait [#allocation4], 4096  }
 0x29e   :  { %1064 = vsyncadd [#allocation4], 4294963200 }
 0x29f   :  { %717 = vsyncpa [#allocation3], 1 }
 0x2a0   :  { %718 = vsyncpa [#allocation6], 1 }
 0x2a1   :  { %719 = vsyncpa [#allocation4], 1 }

</bundles_post_ra>
